<compile_context>
chip_gen: v7x
topology: tpu7x:2x2x1
jax: 0.10.0
libtpu: 0.0.40
codegen_flags: <defaults>
</compile_context>

<pallas_src>
import jax
import jax.numpy as jnp
from jax import lax
from jax.experimental import pallas as pl
from jax.experimental.pallas import tpu as pltpu


# --------------------------------------------------------------------------
# Slab layouts (shared by wrapper packing and in-kernel slicing)
# --------------------------------------------------------------------------
def _ru(x, m):
    return (x + m - 1) // m * m


def _w_layout(H, F):
    """Row offsets of the bf16 matmul weights inside the packed weight slab."""
    off = {"wqkv": 0, "wo": H, "w1": 2 * H, "w2": 3 * H}
    rows = 3 * H + F                 # 160 for H=32, F=64 (multiples of 16: ok for bf16)
    cols = max(3 * H, F)             # 96
    return off, rows, cols


def _p_layout(H, R):
    """Row offsets of every small f32 parameter inside the packed param slab."""
    off = {"bqkv": 0, "bo": 1, "ln1g": 2, "ln1b": 3,
           "b1": 4, "b2": 5, "ln2g": 6, "ln2b": 7,
           "w_ih": 8, "w_hh": 8 + H,
           "b_ih": 8 + H + R, "b_hh": 8 + H + R + 1}
    off["w_fc"] = _ru(8 + H + R + 2, 8)      # 8-row aligned
    off["b_fc"] = off["w_fc"] + R
    rows = _ru(off["b_fc"] + 1, 8)
    return off, rows


# --------------------------------------------------------------------------
# Fused kernel: mini-BERT encoder layer + nn.RNN (tanh) + nn.Linear
# --------------------------------------------------------------------------
def _make_kernel(B, S, H, F, R, wl, po):
    BS = B * S
    scale = 1.0 / (float(H) ** 0.5)

    def kernel(x_ref, mask_ref, w_ref, p_ref, out_ref):
        x = x_ref[...]                                   # (BS, H) f32
        x_bf = x.astype(jnp.bfloat16)

        # ---- static slab views (free) ----
        wqkv = w_ref[wl["wqkv"]:wl["wqkv"] + H, 0:3 * H]   # (H, 3H) bf16
        wo = w_ref[wl["wo"]:wl["wo"] + H, 0:H]
        w1 = w_ref[wl["w1"]:wl["w1"] + H, 0:F]
        w2 = w_ref[wl["w2"]:wl["w2"] + F, 0:H]

        bqkv = p_ref[po["bqkv"]:po["bqkv"] + 1, 0:3 * H]
        bo = p_ref[po["bo"]:po["bo"] + 1, 0:H]
        ln1g = p_ref[po["ln1g"]:po["ln1g"] + 1, 0:H]
        ln1b = p_ref[po["ln1b"]:po["ln1b"] + 1, 0:H]
        b1 = p_ref[po["b1"]:po["b1"] + 1, 0:F]
        b2 = p_ref[po["b2"]:po["b2"] + 1, 0:H]
        ln2g = p_ref[po["ln2g"]:po["ln2g"] + 1, 0:H]
        ln2b = p_ref[po["ln2b"]:po["ln2b"] + 1, 0:H]
        w_ih = p_ref[po["w_ih"]:po["w_ih"] + H, 0:R]       # (H, R) f32
        w_hh = p_ref[po["w_hh"]:po["w_hh"] + R, 0:R]       # (R, R) f32
        b_ih = p_ref[po["b_ih"]:po["b_ih"] + 1, 0:R]
        b_hh = p_ref[po["b_hh"]:po["b_hh"] + 1, 0:R]
        w_fc = p_ref[po["w_fc"]:po["w_fc"] + R, :]         # (R, 128) f32, zero-padded
        b_fc = p_ref[po["b_fc"]:po["b_fc"] + 1, :]         # (1, 128) f32

        # ---- fused Q|K|V projection: one 96-lane matmul ----
        qkv = jnp.dot(x_bf, wqkv, preferred_element_type=jnp.float32) + bqkv
        q = (qkv[:, 0:H] * scale).astype(jnp.bfloat16)     # 1/sqrt(H) folded into q
        k = qkv[:, H:2 * H].astype(jnp.bfloat16)
        v = qkv[:, 2 * H:3 * H].astype(jnp.bfloat16)

        # ---- block-diagonal attention: one (BS,BS) score matmul ----
        scores = lax.dot_general(q, k, (((1,), (1,)), ((), ())),
                                 preferred_element_type=jnp.float32)   # (BS, BS)
        scores = scores + mask_ref[...]                    # block-diag + key-pad bias
        scores = scores - jnp.max(scores, axis=-1, keepdims=True)
        p = jnp.exp(scores)
        p = p * pl.reciprocal(jnp.sum(p, axis=-1, keepdims=True), approx=True)
        attn = jnp.dot(p.astype(jnp.bfloat16), v,
                       preferred_element_type=jnp.float32)             # (BS, H)
        attn = jnp.dot(attn.astype(jnp.bfloat16), wo,
                       preferred_element_type=jnp.float32) + bo

        def _ln(y, g, b):
            mu = jnp.mean(y, axis=-1, keepdims=True)
            var = jnp.mean((y - mu) ** 2, axis=-1, keepdims=True)
            return (y - mu) * lax.rsqrt(var + 1e-12) * g + b

        h1 = _ln(x + attn, ln1g, ln1b)                     # (BS, H) f32

        # ---- FFN ----
        ff = jnp.dot(h1.astype(jnp.bfloat16), w1,
                     preferred_element_type=jnp.float32) + b1
        ff = jax.nn.gelu(ff, approximate=True)
        ff = jnp.dot(ff.astype(jnp.bfloat16), w2,
                     preferred_element_type=jnp.float32) + b2
        hidden = _ln(h1 + ff, ln2g, ln2b)                  # (BS, H) = last_hidden_state

        # ---- gather the B per-sequence last rows with one select matmul ----
        t_ids = lax.broadcasted_iota(jnp.int32, (B, BS), 0)
        c_ids = lax.broadcasted_iota(jnp.int32, (B, BS), 1)
        sel = (c_ids == t_ids * S + (S - 1)).astype(jnp.float32)        # (B, BS) one-hot
        last = jnp.dot(sel, hidden, preferred_element_type=jnp.float32)  # (B, H) f32

        # ---- nn.RNN (batch_first=False semantics), input projection hoisted ----
        xb = (jnp.dot(last, w_ih, preferred_element_type=jnp.float32)
              + b_ih + b_hh)                                             # (B, R)
        h = jnp.zeros((1, R), jnp.float32)
        rows = []
        for t in range(B):                                 # B tiny & static: unrolled
            h = jnp.tanh(xb[t:t + 1, :]
                         + jnp.dot(h, w_hh, preferred_element_type=jnp.float32))
            rows.append(h)
        hs = jnp.concatenate(rows, axis=0)                 # (B, R) = rnn_output[:, -1, :]

        # lane-dense padded logits; caller slices [:, :num_classes]
        out_ref[...] = jnp.dot(hs, w_fc, preferred_element_type=jnp.float32) + b_fc

    return kernel


# --------------------------------------------------------------------------
# Wrapper: slab packing + single grid-less pallas_call
# --------------------------------------------------------------------------
def sentiment_forward(x_emb, attention_mask, bert_params,
                      w_ih_t, w_hh_t, b_ih, b_hh, w_fc_t, b_fc,
                      *, num_classes, cpad=128):
    B, S, H = x_emb.shape
    F = bert_params["w1"].shape[1]
    R = w_hh_t.shape[0]
    C = num_classes
    BS = B * S
    bp = bert_params

    wl, w_rows, w_cols = _w_layout(H, F)
    po, p_rows = _p_layout(H, R)

    # ---- bf16 matmul-weight slab ----
    w_slab = jnp.zeros((w_rows, w_cols), jnp.bfloat16)
    w_slab = w_slab.at[wl["wqkv"]:wl["wqkv"] + H, :3 * H].set(
        jnp.concatenate([bp["wq"], bp["wk"], bp["wv"]], axis=1).astype(jnp.bfloat16))
    w_slab = w_slab.at[wl["wo"]:wl["wo"] + H, :H].set(bp["wo"].astype(jnp.bfloat16))
    w_slab = w_slab.at[wl["w1"]:wl["w1"] + H, :F].set(bp["w1"].astype(jnp.bfloat16))
    w_slab = w_slab.at[wl["w2"]:wl["w2"] + F, :H].set(bp["w2"].astype(jnp.bfloat16))

    # ---- f32 bias / LN / RNN / FC slab (lane width = cpad) ----
    p_slab = jnp.zeros((p_rows, cpad), jnp.float32)

    def setv(slab, row, vec):
        vec = vec.reshape(1, -1)
        return slab.at[row:row + 1, :vec.shape[1]].set(vec)

    p_slab = setv(p_slab, po["bqkv"],
                  jnp.concatenate([bp["bq"], bp["bk"], bp["bv"]], axis=1))
    p_slab = setv(p_slab, po["bo"], bp["bo"])
    p_slab = setv(p_slab, po["ln1g"], bp["ln1_g"])
    p_slab = setv(p_slab, po["ln1b"], bp["ln1_b"])
    p_slab = setv(p_slab, po["b1"], bp["b1"])
    p_slab = setv(p_slab, po["b2"], bp["b2"])
    p_slab = setv(p_slab, po["ln2g"], bp["ln2_g"])
    p_slab = setv(p_slab, po["ln2b"], bp["ln2_b"])
    p_slab = p_slab.at[po["w_ih"]:po["w_ih"] + H, :R].set(w_ih_t)
    p_slab = p_slab.at[po["w_hh"]:po["w_hh"] + R, :R].set(w_hh_t)
    p_slab = setv(p_slab, po["b_ih"], b_ih)
    p_slab = setv(p_slab, po["b_hh"], b_hh)
    p_slab = p_slab.at[po["w_fc"]:po["w_fc"] + R, :C].set(w_fc_t)
    p_slab = setv(p_slab, po["b_fc"], b_fc)

    # ---- block-diagonal additive attention mask (cross-batch keys -> -1e9) ----
    key_bias = (1.0 - attention_mask) * -1e9                   # (B, S)
    same = (jnp.eye(B, dtype=jnp.float32) - 1.0) * 1e9         # 0 on diag, -1e9 off
    mask4 = same[:, None, :, None] + key_bias[None, None, :, :]  # (B,1,B,S)
    mask2d = jnp.broadcast_to(mask4, (B, S, B, S)).reshape(BS, BS).astype(jnp.float32)

    x2d = x_emb.reshape(BS, H)

    kernel = _make_kernel(B, S, H, F, R, wl, po)
    vmem = pl.BlockSpec(memory_space=pltpu.MemorySpace.VMEM)
    logits_pad = pl.pallas_call(
        kernel,
        out_shape=jax.ShapeDtypeStruct((B, cpad), jnp.float32),
        in_specs=[vmem, vmem, vmem, vmem],
        out_specs=vmem,
    )(x2d, mask2d, w_slab, p_slab)

    return logits_pad[:, :num_classes]


# --------------------------------------------------------------------------
# Pure-JAX f32 reference (full-fidelity: RNN over all S "batch" rows)
# --------------------------------------------------------------------------
def _ref_forward(x_emb, mask_bias, bp, w_ih_t, w_hh_t, b_ih, b_hh, w_fc_t, b_fc):
    def ln(y, g, b):
        mu = y.mean(-1, keepdims=True)
        var = ((y - mu) ** 2).mean(-1, keepdims=True)
        return (y - mu) / jnp.sqrt(var + 1e-12) * g + b

    H = x_emb.shape[-1]
    q = x_emb @ bp["wq"] + bp["bq"]
    k = x_emb @ bp["wk"] + bp["bk"]
    v = x_emb @ bp["wv"] + bp["bv"]
    scores = jnp.einsum("bsh,bth->bst", q, k) / jnp.sqrt(jnp.float32(H)) + mask_bias
    p = jax.nn.softmax(scores, axis=-1)
    attn = jnp.einsum("bst,bth->bsh", p, v) @ bp["wo"] + bp["bo"]
    h1 = ln(x_emb + attn, bp["ln1_g"], bp["ln1_b"])
    ff = jax.nn.gelu(h1 @ bp["w1"] + bp["b1"], approximate=True) @ bp["w2"] + bp["b2"]
    hidden = ln(h1 + ff, bp["ln2_g"], bp["ln2_b"])

    S = hidden.shape[1]
    R = w_hh_t.shape[0]

    def step(h, x_t):
        h_new = jnp.tanh(x_t @ w_ih_t + b_ih + h @ w_hh_t + b_hh)
        return h_new, h_new

    _, hs = lax.scan(step, jnp.zeros((S, R), jnp.float32), hidden)
    return hs[:, -1, :] @ w_fc_t + b_fc


# --------------------------------------------------------------------------
if __name__ == "__main__":
    B, S = 2, 8                 # batch, sequence length
    H = 32                      # bert_model.config.hidden_size
    F = 64                      # encoder FFN width
    R = 16                      # rnn_hidden_size
    C = 3                       # num_classes
    VOCAB = 100

    key = jax.random.PRNGKey(0)
    ks = jax.random.split(key, 24)

    def u(k, shape, fan_in):
        s = 1.0 / jnp.sqrt(jnp.float32(fan_in))
        return jax.random.uniform(k, shape, jnp.float32, -s, s)

    # ---- stand-in BERT parameters (deterministic, f32 master copies) ----
    tok_emb = 0.02 * jax.random.normal(ks[0], (VOCAB, H), jnp.float32)
    pos_emb = 0.02 * jax.random.normal(ks[1], (S, H), jnp.float32)
    bert_f32 = {
        "wq": u(ks[2], (H, H), H), "bq": u(ks[3], (1, H), H),
        "wk": u(ks[4], (H, H), H), "bk": u(ks[5], (1, H), H),
        "wv": u(ks[6], (H, H), H), "bv": u(ks[7], (1, H), H),
        "wo": u(ks[8], (H, H), H), "bo": u(ks[9], (1, H), H),
        "ln1_g": jnp.ones((1, H), jnp.float32),
        "ln1_b": jnp.zeros((1, H), jnp.float32),
        "w1": u(ks[10], (H, F), H), "b1": u(ks[11], (1, F), H),
        "w2": u(ks[12], (F, H), F), "b2": u(ks[13], (1, H), F),
        "ln2_g": jnp.ones((1, H), jnp.float32),
        "ln2_b": jnp.zeros((1, H), jnp.float32),
    }

    # ---- nn.RNN / nn.Linear parameters (PyTorch-style uniform init) ----
    w_ih_t = u(ks[14], (H, R), R)        # W_ih^T : (input, hidden)
    w_hh_t = u(ks[15], (R, R), R)        # W_hh^T
    b_ih = u(ks[16], (1, R), R)
    b_hh = u(ks[17], (1, R), R)
    w_fc_t = u(ks[18], (R, C), R)        # fc.weight^T
    b_fc = u(ks[19], (1, C), R)

    # ---- inputs ----
    input_ids = jax.random.randint(ks[20], (B, S), 0, VOCAB, jnp.int32)
    attention_mask = jnp.array([[1] * S, [1] * (S - 2) + [0] * 2], jnp.float32)

    # glue: embedding lookup (gather) in plain JAX
    x_emb = tok_emb[input_ids] + pos_emb[None, :, :]            # (B, S, H)
    mask_bias = (1.0 - attention_mask)[:, None, :] * -1e9       # (B, 1, S) for reference

    # ---- fused forward (single grid-less pallas_call) ----
    logits = sentiment_forward(x_emb, attention_mask, bert_f32,
                               w_ih_t, w_hh_t, b_ih, b_hh, w_fc_t, b_fc,
                               num_classes=C)
    logits = jax.block_until_ready(logits)

    # ---- correctness check vs full-precision reference ----
    ref = _ref_forward(x_emb, mask_bias, bert_f32,
                       w_ih_t, w_hh_t, b_ih, b_hh, w_fc_t, b_fc)
    assert logits.shape == (B, C)
    # bf16 matmul inputs + approx reciprocal vs an all-f32 reference: 2e-2 tol.
    assert jnp.allclose(logits, ref, rtol=2e-2, atol=2e-2), (logits, ref)

    print("KERNEL_OK")
</pallas_src>

<mosaic_0001>
module attributes {stable_mosaic.version = 11 : i64} {
  func.func @kernel(%arg0: memref<16x32xf32, #tpu.memory_space<vmem>>, %arg1: memref<16x16xf32, #tpu.memory_space<vmem>>, %arg2: memref<160x96xbf16, #tpu.memory_space<vmem>>, %arg3: memref<88x128xf32, #tpu.memory_space<vmem>>, %arg4: memref<2x128xf32, #tpu.memory_space<vmem>>) attributes {dimension_semantics = [], scalar_prefetch = 0 : i64, scratch_operands = 0 : i64, tpu.core_type = #tpu.core_type<tc>} {
    %c0 = arith.constant 0 : index
    %c0_0 = arith.constant 0 : index
    %0 = vector.load %arg0[%c0, %c0_0] : memref<16x32xf32, #tpu.memory_space<vmem>>, vector<16x32xf32>
    %1 = arith.truncf %0 : vector<16x32xf32> to vector<16x32xbf16>
    %c0_1 = arith.constant 0 : index
    %c0_2 = arith.constant 0 : index
    %2 = vector.load %arg2[%c0_1, %c0_2] : memref<160x96xbf16, #tpu.memory_space<vmem>>, vector<32x96xbf16>
    %c32 = arith.constant 32 : index
    %c0_3 = arith.constant 0 : index
    %3 = vector.load %arg2[%c32, %c0_3] : memref<160x96xbf16, #tpu.memory_space<vmem>>, vector<32x32xbf16>
    %c64 = arith.constant 64 : index
    %c0_4 = arith.constant 0 : index
    %4 = vector.load %arg2[%c64, %c0_4] : memref<160x96xbf16, #tpu.memory_space<vmem>>, vector<32x64xbf16>
    %c96 = arith.constant 96 : index
    %c0_5 = arith.constant 0 : index
    %5 = vector.load %arg2[%c96, %c0_5] : memref<160x96xbf16, #tpu.memory_space<vmem>>, vector<64x32xbf16>
    %c0_6 = arith.constant 0 : index
    %c0_7 = arith.constant 0 : index
    %6 = vector.load %arg3[%c0_6, %c0_7] : memref<88x128xf32, #tpu.memory_space<vmem>>, vector<1x96xf32>
    %c1 = arith.constant 1 : index
    %c0_8 = arith.constant 0 : index
    %7 = vector.load %arg3[%c1, %c0_8] : memref<88x128xf32, #tpu.memory_space<vmem>>, vector<1x32xf32>
    %c2 = arith.constant 2 : index
    %c0_9 = arith.constant 0 : index
    %8 = vector.load %arg3[%c2, %c0_9] : memref<88x128xf32, #tpu.memory_space<vmem>>, vector<1x32xf32>
    %c3 = arith.constant 3 : index
    %c0_10 = arith.constant 0 : index
    %9 = vector.load %arg3[%c3, %c0_10] : memref<88x128xf32, #tpu.memory_space<vmem>>, vector<1x32xf32>
    %c4 = arith.constant 4 : index
    %c0_11 = arith.constant 0 : index
    %10 = vector.load %arg3[%c4, %c0_11] : memref<88x128xf32, #tpu.memory_space<vmem>>, vector<1x64xf32>
    %c5 = arith.constant 5 : index
    %c0_12 = arith.constant 0 : index
    %11 = vector.load %arg3[%c5, %c0_12] : memref<88x128xf32, #tpu.memory_space<vmem>>, vector<1x32xf32>
    %c6 = arith.constant 6 : index
    %c0_13 = arith.constant 0 : index
    %12 = vector.load %arg3[%c6, %c0_13] : memref<88x128xf32, #tpu.memory_space<vmem>>, vector<1x32xf32>
    %c7 = arith.constant 7 : index
    %c0_14 = arith.constant 0 : index
    %13 = vector.load %arg3[%c7, %c0_14] : memref<88x128xf32, #tpu.memory_space<vmem>>, vector<1x32xf32>
    %c8 = arith.constant 8 : index
    %c0_15 = arith.constant 0 : index
    %14 = vector.load %arg3[%c8, %c0_15] : memref<88x128xf32, #tpu.memory_space<vmem>>, vector<32x16xf32>
    %c40 = arith.constant 40 : index
    %c0_16 = arith.constant 0 : index
    %15 = vector.load %arg3[%c40, %c0_16] : memref<88x128xf32, #tpu.memory_space<vmem>>, vector<16x16xf32>
    %c56 = arith.constant 56 : index
    %c0_17 = arith.constant 0 : index
    %16 = vector.load %arg3[%c56, %c0_17] : memref<88x128xf32, #tpu.memory_space<vmem>>, vector<1x16xf32>
    %c57 = arith.constant 57 : index
    %c0_18 = arith.constant 0 : index
    %17 = vector.load %arg3[%c57, %c0_18] : memref<88x128xf32, #tpu.memory_space<vmem>>, vector<1x16xf32>
    %c64_19 = arith.constant 64 : index
    %c0_20 = arith.constant 0 : index
    %18 = vector.load %arg3[%c64_19, %c0_20] : memref<88x128xf32, #tpu.memory_space<vmem>>, vector<16x128xf32>
    %c80 = arith.constant 80 : index
    %c0_21 = arith.constant 0 : index
    %19 = vector.load %arg3[%c80, %c0_21] : memref<88x128xf32, #tpu.memory_space<vmem>>, vector<1x128xf32>
    %cst = arith.constant dense<0.000000e+00> : vector<16x96xf32>
    %20 = tpu.matmul %1, %2, %cst {dimension_numbers = #tpu.dot_dimension_numbers<[1], [0], [0], [1], [0, 0, 1, 1], [], []>} : vector<16x32xbf16>, vector<32x96xbf16>, vector<16x96xf32> -> vector<16x96xf32>
    %21 = vector.broadcast %6 : vector<1x96xf32> to vector<16x96xf32>
    %22 = arith.addf %20, %21 : vector<16x96xf32>
    %23 = vector.extract_strided_slice %22 {offsets = [0, 0], sizes = [16, 32], strides = [1, 1]} : vector<16x96xf32> to vector<16x32xf32>
    %cst_22 = arith.constant 0.176776692 : f32
    %24 = vector.broadcast %cst_22 : f32 to vector<16x32xf32>
    %25 = arith.mulf %23, %24 : vector<16x32xf32>
    %26 = arith.truncf %25 : vector<16x32xf32> to vector<16x32xbf16>
    %27 = vector.extract_strided_slice %22 {offsets = [0, 32], sizes = [16, 32], strides = [1, 1]} : vector<16x96xf32> to vector<16x32xf32>
    %28 = arith.truncf %27 : vector<16x32xf32> to vector<16x32xbf16>
    %29 = vector.extract_strided_slice %22 {offsets = [0, 64], sizes = [16, 32], strides = [1, 1]} : vector<16x96xf32> to vector<16x32xf32>
    %30 = arith.truncf %29 : vector<16x32xf32> to vector<16x32xbf16>
    %cst_23 = arith.constant dense<0.000000e+00> : vector<16x16xf32>
    %31 = tpu.matmul %26, %28, %cst_23 {dimension_numbers = #tpu.dot_dimension_numbers<[1], [1], [0], [0], [0, 0, 1, 0], [], []>} : vector<16x32xbf16>, vector<16x32xbf16>, vector<16x16xf32> -> vector<16x16xf32>
    %c0_24 = arith.constant 0 : index
    %c0_25 = arith.constant 0 : index
    %32 = vector.load %arg1[%c0_24, %c0_25] : memref<16x16xf32, #tpu.memory_space<vmem>>, vector<16x16xf32>
    %33 = arith.addf %31, %32 : vector<16x16xf32>
    %cst_26 = arith.constant dense<0xFF800000> : vector<16xf32>
    %34 = vector.multi_reduction <maximumf>, %33, %cst_26 [1] : vector<16x16xf32> to vector<16xf32>
    %35 = vector.shape_cast %34 : vector<16xf32> to vector<16x1xf32>
    %36 = vector.broadcast %35 : vector<16x1xf32> to vector<16x16xf32>
    %37 = arith.subf %33, %36 : vector<16x16xf32>
    %38 = math.exp %37 : vector<16x16xf32>
    %cst_27 = arith.constant dense<0.000000e+00> : vector<16xf32>
    %39 = vector.multi_reduction <add>, %38, %cst_27 [1] : vector<16x16xf32> to vector<16xf32>
    %40 = vector.shape_cast %39 : vector<16xf32> to vector<16x1xf32>
    %41 = tpu.reciprocal %40 {approx = true} : vector<16x1xf32> -> vector<16x1xf32>
    %42 = vector.broadcast %41 : vector<16x1xf32> to vector<16x16xf32>
    %43 = arith.mulf %38, %42 : vector<16x16xf32>
    %44 = arith.truncf %43 : vector<16x16xf32> to vector<16x16xbf16>
    %cst_28 = arith.constant dense<0.000000e+00> : vector<16x32xf32>
    %45 = tpu.matmul %44, %30, %cst_28 {dimension_numbers = #tpu.dot_dimension_numbers<[1], [0], [0], [1], [0, 0, 1, 1], [], []>} : vector<16x16xbf16>, vector<16x32xbf16>, vector<16x32xf32> -> vector<16x32xf32>
    %46 = arith.truncf %45 : vector<16x32xf32> to vector<16x32xbf16>
    %cst_29 = arith.constant dense<0.000000e+00> : vector<16x32xf32>
    %47 = tpu.matmul %46, %3, %cst_29 {dimension_numbers = #tpu.dot_dimension_numbers<[1], [0], [0], [1], [0, 0, 1, 1], [], []>} : vector<16x32xbf16>, vector<32x32xbf16>, vector<16x32xf32> -> vector<16x32xf32>
    %48 = vector.broadcast %7 : vector<1x32xf32> to vector<16x32xf32>
    %49 = arith.addf %47, %48 : vector<16x32xf32>
    %50 = arith.addf %0, %49 : vector<16x32xf32>
    %cst_30 = arith.constant dense<0.000000e+00> : vector<16xf32>
    %51 = vector.multi_reduction <add>, %50, %cst_30 [1] : vector<16x32xf32> to vector<16xf32>
    %52 = vector.shape_cast %51 : vector<16xf32> to vector<16x1xf32>
    %cst_31 = arith.constant 3.200000e+01 : f32
    %53 = vector.broadcast %cst_31 : f32 to vector<16x1xf32>
    %54 = arith.divf %52, %53 : vector<16x1xf32>
    %55 = vector.broadcast %54 : vector<16x1xf32> to vector<16x32xf32>
    %56 = arith.subf %50, %55 : vector<16x32xf32>
    %57 = arith.mulf %56, %56 : vector<16x32xf32>
    %cst_32 = arith.constant dense<0.000000e+00> : vector<16xf32>
    %58 = vector.multi_reduction <add>, %57, %cst_32 [1] : vector<16x32xf32> to vector<16xf32>
    %59 = vector.shape_cast %58 : vector<16xf32> to vector<16x1xf32>
    %cst_33 = arith.constant 3.200000e+01 : f32
    %60 = vector.broadcast %cst_33 : f32 to vector<16x1xf32>
    %61 = arith.divf %59, %60 : vector<16x1xf32>
    %62 = vector.broadcast %54 : vector<16x1xf32> to vector<16x32xf32>
    %63 = arith.subf %50, %62 : vector<16x32xf32>
    %cst_34 = arith.constant 9.99999996E-13 : f32
    %64 = vector.broadcast %cst_34 : f32 to vector<16x1xf32>
    %65 = arith.addf %61, %64 : vector<16x1xf32>
    %66 = math.rsqrt %65 : vector<16x1xf32>
    %67 = vector.broadcast %66 : vector<16x1xf32> to vector<16x32xf32>
    %68 = arith.mulf %63, %67 : vector<16x32xf32>
    %69 = vector.broadcast %8 : vector<1x32xf32> to vector<16x32xf32>
    %70 = arith.mulf %68, %69 : vector<16x32xf32>
    %71 = vector.broadcast %9 : vector<1x32xf32> to vector<16x32xf32>
    %72 = arith.addf %70, %71 : vector<16x32xf32>
    %73 = arith.truncf %72 : vector<16x32xf32> to vector<16x32xbf16>
    %cst_35 = arith.constant dense<0.000000e+00> : vector<16x64xf32>
    %74 = tpu.matmul %73, %4, %cst_35 {dimension_numbers = #tpu.dot_dimension_numbers<[1], [0], [0], [1], [0, 0, 1, 1], [], []>} : vector<16x32xbf16>, vector<32x64xbf16>, vector<16x64xf32> -> vector<16x64xf32>
    %75 = vector.broadcast %10 : vector<1x64xf32> to vector<16x64xf32>
    %76 = arith.addf %74, %75 : vector<16x64xf32>
    %77 = arith.mulf %76, %76 : vector<16x64xf32>
    %78 = arith.mulf %76, %77 : vector<16x64xf32>
    %cst_36 = arith.constant 4.471500e-02 : f32
    %79 = vector.broadcast %cst_36 : f32 to vector<16x64xf32>
    %80 = arith.mulf %79, %78 : vector<16x64xf32>
    %81 = arith.addf %76, %80 : vector<16x64xf32>
    %cst_37 = arith.constant 0.797884583 : f32
    %82 = vector.broadcast %cst_37 : f32 to vector<16x64xf32>
    %83 = arith.mulf %82, %81 : vector<16x64xf32>
    %84 = math.tanh %83 : vector<16x64xf32>
    %cst_38 = arith.constant 1.000000e+00 : f32
    %85 = vector.broadcast %cst_38 : f32 to vector<16x64xf32>
    %86 = arith.addf %85, %84 : vector<16x64xf32>
    %cst_39 = arith.constant 5.000000e-01 : f32
    %87 = vector.broadcast %cst_39 : f32 to vector<16x64xf32>
    %88 = arith.mulf %87, %86 : vector<16x64xf32>
    %89 = arith.mulf %76, %88 : vector<16x64xf32>
    %90 = arith.truncf %89 : vector<16x64xf32> to vector<16x64xbf16>
    %cst_40 = arith.constant dense<0.000000e+00> : vector<16x32xf32>
    %91 = tpu.matmul %90, %5, %cst_40 {dimension_numbers = #tpu.dot_dimension_numbers<[1], [0], [0], [1], [0, 0, 1, 1], [], []>} : vector<16x64xbf16>, vector<64x32xbf16>, vector<16x32xf32> -> vector<16x32xf32>
    %92 = vector.broadcast %11 : vector<1x32xf32> to vector<16x32xf32>
    %93 = arith.addf %91, %92 : vector<16x32xf32>
    %94 = arith.addf %72, %93 : vector<16x32xf32>
    %cst_41 = arith.constant dense<0.000000e+00> : vector<16xf32>
    %95 = vector.multi_reduction <add>, %94, %cst_41 [1] : vector<16x32xf32> to vector<16xf32>
    %96 = vector.shape_cast %95 : vector<16xf32> to vector<16x1xf32>
    %cst_42 = arith.constant 3.200000e+01 : f32
    %97 = vector.broadcast %cst_42 : f32 to vector<16x1xf32>
    %98 = arith.divf %96, %97 : vector<16x1xf32>
    %99 = vector.broadcast %98 : vector<16x1xf32> to vector<16x32xf32>
    %100 = arith.subf %94, %99 : vector<16x32xf32>
    %101 = arith.mulf %100, %100 : vector<16x32xf32>
    %cst_43 = arith.constant dense<0.000000e+00> : vector<16xf32>
    %102 = vector.multi_reduction <add>, %101, %cst_43 [1] : vector<16x32xf32> to vector<16xf32>
    %103 = vector.shape_cast %102 : vector<16xf32> to vector<16x1xf32>
    %cst_44 = arith.constant 3.200000e+01 : f32
    %104 = vector.broadcast %cst_44 : f32 to vector<16x1xf32>
    %105 = arith.divf %103, %104 : vector<16x1xf32>
    %106 = vector.broadcast %98 : vector<16x1xf32> to vector<16x32xf32>
    %107 = arith.subf %94, %106 : vector<16x32xf32>
    %cst_45 = arith.constant 9.99999996E-13 : f32
    %108 = vector.broadcast %cst_45 : f32 to vector<16x1xf32>
    %109 = arith.addf %105, %108 : vector<16x1xf32>
    %110 = math.rsqrt %109 : vector<16x1xf32>
    %111 = vector.broadcast %110 : vector<16x1xf32> to vector<16x32xf32>
    %112 = arith.mulf %107, %111 : vector<16x32xf32>
    %113 = vector.broadcast %12 : vector<1x32xf32> to vector<16x32xf32>
    %114 = arith.mulf %112, %113 : vector<16x32xf32>
    %115 = vector.broadcast %13 : vector<1x32xf32> to vector<16x32xf32>
    %116 = arith.addf %114, %115 : vector<16x32xf32>
    %117 = tpu.iota {dimensions = array<i32: 0>} : vector<2x16xi32>
    %118 = tpu.iota {dimensions = array<i32: 1>} : vector<2x16xi32>
    %c8_i32 = arith.constant 8 : i32
    %119 = vector.broadcast %c8_i32 : i32 to vector<2x16xi32>
    %120 = arith.muli %117, %119 : vector<2x16xi32>
    %c7_i32 = arith.constant 7 : i32
    %121 = vector.broadcast %c7_i32 : i32 to vector<2x16xi32>
    %122 = arith.addi %120, %121 : vector<2x16xi32>
    %123 = arith.cmpi eq, %118, %122 : vector<2x16xi32>
    %124 = arith.extui %123 : vector<2x16xi1> to vector<2x16xi32>
    %125 = arith.sitofp %124 : vector<2x16xi32> to vector<2x16xf32>
    %cst_46 = arith.constant dense<0.000000e+00> : vector<2x32xf32>
    %126 = tpu.matmul %125, %116, %cst_46 {dimension_numbers = #tpu.dot_dimension_numbers<[1], [0], [0], [1], [0, 0, 1, 1], [], []>} : vector<2x16xf32>, vector<16x32xf32>, vector<2x32xf32> -> vector<2x32xf32>
    %cst_47 = arith.constant dense<0.000000e+00> : vector<2x16xf32>
    %127 = tpu.matmul %126, %14, %cst_47 {dimension_numbers = #tpu.dot_dimension_numbers<[1], [0], [0], [1], [0, 0, 1, 1], [], []>} : vector<2x32xf32>, vector<32x16xf32>, vector<2x16xf32> -> vector<2x16xf32>
    %128 = vector.broadcast %16 : vector<1x16xf32> to vector<2x16xf32>
    %129 = arith.addf %127, %128 : vector<2x16xf32>
    %130 = vector.broadcast %17 : vector<1x16xf32> to vector<2x16xf32>
    %131 = arith.addf %129, %130 : vector<2x16xf32>
    %cst_48 = arith.constant 0.000000e+00 : f32
    %132 = vector.broadcast %cst_48 : f32 to vector<1x16xf32>
    %133 = vector.extract_strided_slice %131 {offsets = [0, 0], sizes = [1, 16], strides = [1, 1]} : vector<2x16xf32> to vector<1x16xf32>
    %cst_49 = arith.constant dense<0.000000e+00> : vector<1x16xf32>
    %134 = tpu.matmul %132, %15, %cst_49 {dimension_numbers = #tpu.dot_dimension_numbers<[1], [0], [0], [1], [0, 0, 1, 1], [], []>} : vector<1x16xf32>, vector<16x16xf32>, vector<1x16xf32> -> vector<1x16xf32>
    %135 = arith.addf %133, %134 : vector<1x16xf32>
    %136 = math.tanh %135 : vector<1x16xf32>
    %137 = vector.extract_strided_slice %131 {offsets = [1, 0], sizes = [1, 16], strides = [1, 1]} : vector<2x16xf32> to vector<1x16xf32>
    %cst_50 = arith.constant dense<0.000000e+00> : vector<1x16xf32>
    %138 = tpu.matmul %136, %15, %cst_50 {dimension_numbers = #tpu.dot_dimension_numbers<[1], [0], [0], [1], [0, 0, 1, 1], [], []>} : vector<1x16xf32>, vector<16x16xf32>, vector<1x16xf32> -> vector<1x16xf32>
    %139 = arith.addf %137, %138 : vector<1x16xf32>
    %140 = math.tanh %139 : vector<1x16xf32>
    %141 = tpu.concatenate %136, %140 in 0 : vector<1x16xf32>, vector<1x16xf32> -> vector<2x16xf32>
    %cst_51 = arith.constant dense<0.000000e+00> : vector<2x128xf32>
    %142 = tpu.matmul %141, %18, %cst_51 {dimension_numbers = #tpu.dot_dimension_numbers<[1], [0], [0], [1], [0, 0, 1, 1], [], []>} : vector<2x16xf32>, vector<16x128xf32>, vector<2x128xf32> -> vector<2x128xf32>
    %143 = vector.broadcast %19 : vector<1x128xf32> to vector<2x128xf32>
    %144 = arith.addf %142, %143 : vector<2x128xf32>
    %c0_52 = arith.constant 0 : index
    %c0_53 = arith.constant 0 : index
    %145 = vector.load %arg4[%c0_52, %c0_53] : memref<2x128xf32, #tpu.memory_space<vmem>>, vector<2x128xf32>
    tpu.vector_store %arg4[%c0_52, %c0_53], %144 {strides = array<i32>} : memref<2x128xf32, #tpu.memory_space<vmem>>, vector<2x128xf32>,
    return
  }
}

</mosaic_0001>

<bundles_post_ra>
// kernel: tpu_custom_call.1
= control target key start
LH: loop header
LB: loop body
LE: loop exit
PB: predicated region body
PF: predicated region fallthrough
CT: control target
= control target key end

     0   :  { %9 = vsyncpa [#allocation3], 0  ;;  %s1533_s0 = inlined_call_operand.hbm [shape: f32[16,32], index: 0, kind: input, shape index: {}]   ;;  %s1534_s1 = inlined_call_operand.hbm [shape: f32[16,16], index: 1, kind: input, shape index: {}]   ;;  %s1535_s2 = inlined_call_operand.hbm [shape: bf16[160,96], index: 2, kind: input, shape index: {}]   ;;  %s1536_s3 = inlined_call_operand.hbm [shape: f32[88,128], index: 3, kind: input, shape index: {}]   ;;  %s1537_s4 = inlined_call_operand.hbm [shape: f32[2,128], index: 4, kind: output, shape index: {}]  }
   0x1   :  { %10 = vsyncpa [#allocation6], 0 }
   0x2   :  { %11 = vsyncpa [#allocation9], 0 }
   0x3   :  { %12 = vsyncpa [#allocation4], 0  ;;  %s1350_s15 = smov [#allocation5]   ;;  %s1351_s17 = smov [#allocation2]  }
   0x4   :  { %s30_s16 = sshll.u32 %s1350_s15, 4  ;;  %s18_s18 = sshll.u32 %s1351_s17, 4  ;;  %s31_s16 = int_to_ptr.vmem [resolvable:$true] %s30_s16  ;;  %s1388_s18 = int_to_ptr.vmem [resolvable:$true] %s18_s18 }
   0x5   :  { %s1232_s21 = scalar_lea.hbm %s1534_s1, 256 }
   0x6   :  { %p1233_p0 = scmp.ne.s32.totalorder %s1534_s1, %s1232_s21  ;;  %p1236_p1 = scmp.lt.u32.totalorder %s1232_s21, %s1534_s1 }
   0x8   :  { %p1238_p2 = pnand %p1236_p1, %p1233_p0 }
   0xa   :  { %1241 = shalt.err (!%p1238_p2)
}
   0xb   :  { %s1242_s26 = scalar_lea.vmem %s31_s16, 256  ;;  %p1247_p4 = scmp.lt.s32.totalorder %s31_s16, %s31_s16 }
   0xc   :  { %p1243_p3 = scmp.ne.s32.totalorder %s31_s16, %s1242_s26  ;;  %p1248_p5 = scmp.lt.s32.totalorder %s1242_s26, %s1242_s26 }
   0xe   :  { %p1249_p6 = por %p1248_p5, %p1247_p4 }
  0x10   :  { %p1250_p7 = pnand %p1249_p6, %p1243_p3 }
  0x12   :  { %1253 = shalt.err (!%p1250_p7)
}
  0x13   :  { %s1352_s27 = smov 128   ;;  %s1353_s28 = smov 8  }
  0x14   :  { %36 = dma.hbm_to_vmem [thread:$0]  %s1534_s1, 256, %s31_s16, [#allocation6], %s1352_s27, %s1352_s27, %s1353_s28  }
  0x15   :  { %s1254_s7 = scalar_lea.hbm %s1533_s0, 256 }
  0x16   :  { %p1255_p8 = scmp.ne.s32.totalorder %s1533_s0, %s1254_s7  ;;  %p1258_p9 = scmp.lt.u32.totalorder %s1254_s7, %s1533_s0 }
  0x18   :  { %p1260_p10 = pnand %p1258_p9, %p1255_p8 }
  0x1a   :  { %1263 = shalt.err (!%p1260_p10)
}
  0x1b   :  { %s1264_s12 = scalar_lea.vmem %s1388_s18, 256  ;;  %p1269_p12 = scmp.lt.s32.totalorder %s1388_s18, %s1388_s18 }
  0x1c   :  { %p1265_p11 = scmp.ne.s32.totalorder %s1388_s18, %s1264_s12  ;;  %p1270_p13 = scmp.lt.s32.totalorder %s1264_s12, %s1264_s12 }
  0x1e   :  { %p1271_p0 = por %p1270_p13, %p1269_p12 }
  0x20   :  { %p1272_p1 = pnand %p1271_p0, %p1265_p11 }
  0x22   :  { %1275 = shalt.err (!%p1272_p1)
}
  0x23   :  { %24 = dma.hbm_to_vmem [thread:$0]  %s1533_s0, 256, %s1388_s18, [#allocation3], %s1352_s27, %s1352_s27, %s1353_s28  }
  0x24   :  { %s1354_s14 = smov [#allocation7]   ;;  %s1276_s19 = scalar_lea.hbm %s1535_s2, 1280 }
  0x25   :  { %s42_s15 = sshll.u32 %s1354_s14, 4  ;;  %p1277_p2 = scmp.ne.s32.totalorder %s1535_s2, %s1276_s19  ;;  %s43_s15 = int_to_ptr.vmem [resolvable:$true] %s42_s15 }
  0x26   :  { %p1280_p3 = scmp.lt.u32.totalorder %s1276_s19, %s1535_s2 }
  0x28   :  { %p1282_p4 = pnand %p1280_p3, %p1277_p2 }
  0x2a   :  { %1285 = shalt.err (!%p1282_p4)
}
  0x2b   :  { %s1286_s24 = scalar_lea.vmem %s43_s15, 1280  ;;  %p1291_p6 = scmp.lt.s32.totalorder %s43_s15, %s43_s15 }
  0x2c   :  { %p1287_p5 = scmp.ne.s32.totalorder %s43_s15, %s1286_s24  ;;  %p1292_p7 = scmp.lt.s32.totalorder %s1286_s24, %s1286_s24 }
  0x2e   :  { %p1293_p8 = por %p1292_p7, %p1291_p6 }
  0x30   :  { %p1294_p9 = pnand %p1293_p8, %p1287_p5 }
  0x32   :  { %1297 = shalt.err (!%p1294_p9)
}
  0x33   :  { %s1355_s0 = smov 64   ;;  %s1356_s18 = smov 4  }
  0x34   :  { %48 = dma.hbm_to_vmem [thread:$0]  %s1535_s2, 1280, %s43_s15, [#allocation6], %s1355_s0, %s1355_s0, %s1356_s18  }
  0x35   :  { %s1357_s29 = smov [#allocation8]   ;;  %s1298_s7 = scalar_lea.hbm %s1536_s3, 1408 }
  0x36   :  { %s54_s30 = sshll.u32 %s1357_s29, 4  ;;  %p1299_p10 = scmp.ne.s32.totalorder %s1536_s3, %s1298_s7  ;;  %s55_s30 = int_to_ptr.vmem [resolvable:$true] %s54_s30 }
  0x37   :  { %p1302_p11 = scmp.lt.u32.totalorder %s1298_s7, %s1536_s3 }
  0x39   :  { %p1304_p12 = pnand %p1302_p11, %p1299_p10 }
  0x3b   :  { %1307 = shalt.err (!%p1304_p12)
}
  0x3c   :  { %s1308_s12 = scalar_lea.vmem %s55_s30, 1408  ;;  %p1313_p0 = scmp.lt.s32.totalorder %s55_s30, %s55_s30 }
  0x3d   :  { %p1309_p13 = scmp.ne.s32.totalorder %s55_s30, %s1308_s12  ;;  %p1314_p1 = scmp.lt.s32.totalorder %s1308_s12, %s1308_s12 }
  0x3f   :  { %p1315_p2 = por %p1314_p1, %p1313_p0 }
  0x41   :  { %p1316_p3 = pnand %p1315_p2, %p1309_p13 }
  0x43   :  { %1319 = shalt.err (!%p1316_p3)
}
  0x44   :  { %60 = dma.hbm_to_vmem [thread:$0]  %s1536_s3, 1408, %s55_s30, [#allocation9], %s1352_s27, %s1352_s27, %s1353_s28  }
  0x45   :  { %1342 = dma.done.wait [#allocation3], 256  }
  0x46   :  { %1343 = vsyncadd [#allocation3], 4294967040 }
  0x47   :  { %1344 = dma.done.wait [#allocation6], 1536  }
  0x48   :  { %1345 = vsyncadd [#allocation6], 4294965760 }
  0x49   :  { %1346 = dma.done.wait [#allocation9], 1408  }
  0x4a   :  { %1347 = vsyncadd [#allocation9], 4294965888  ;;  %v1358_v0 = vmov 0.0   ;;  %vm1359_vm0 = vmmov 0   ;;  %v1198_v1 = vld [vmem:[#allocation7] sm:$0xff]   ;;  %v1199_v2 = vld [vmem:[#allocation7 + $0x8] sm:$0xff]  }
  0x4b   :  { %1080 = vmatprep.subr.bf16.mxu0 %v1358_v0  ;;  %1084 = vmatprep.mubr.msk.bf16.mxu0 %vm1359_vm0, %v1358_v0  ;;  %v1460_v3 = vld [vmem:[#allocation2] sm:$0xff]  ;;  %v1462_v4 = vld [vmem:[#allocation2 + $0x8] sm:$0xff]  ;;  %vm132_vm1 = vcmask 261120   ;;  %v1013_v6 = vld [vmem:[#allocation8] ss:$0 sm:$0xff]  ;;  %s1360_s3 = smov 96  }
  0x4c   :  { %1088 = vmatprep.subr.bf16.mxu1 %v1358_v0  ;;  %1090 = vmatprep.mubr.msk.bf16.mxu1 %vm1359_vm0, %v1358_v0  ;;  %v76_v5 = vpack.c.bf16 %v1462_v4, %v1460_v3  ;;  %v181_v19 = vld [vmem:[#allocation5] sm:$0xff]  ;;  %v182_v21 = vld [vmem:[#allocation5 + $0x8] sm:$0xff]  ;;  %vm233_vm2 = vcmask 130048   ;;  %vm514_vm3 = vcmask 523264   ;;  %vm916_vm5 = vcmask 1040384   ;;  %s1362_s27 = smov [#allocation10]  }
  0x4d   :  { %1081 = vmatpush3.bf16.msra.mxu0 %v1198_v1  ;;  %v1200_v39 = vld [vmem:[#allocation7 + $0x10] sm:$0xff]   ;;  %v1201_v48 = vld [vmem:[#allocation7 + $0x18] sm:$0xff]   ;;  %s1002_s28 = sshll.u32 %s1362_s27, 4  ;;  %s1003_s28 = int_to_ptr.vmem [resolvable:$true] %s1002_s28 }
  0x4e   :  { %1082 = vmatprep.subr.bf16.mxu0 %v1358_v0  ;;  %v1019_v54 = vld [vmem:[#allocation8 + $0x1] ss:$0 sm:$0xff]  ;;  %s1320_s13 = scalar_lea.vmem %s1003_s28, 32  ;;  %p1325_p5 = scmp.lt.s32.totalorder %s1003_s28, %s1003_s28 }
  0x4f   :  { %p1321_p4 = scmp.ne.s32.totalorder %s1003_s28, %s1320_s13  ;;  %p1326_p6 = scmp.lt.s32.totalorder %s1320_s13, %s1320_s13 }
  0x51   :  { %1083 = vmatpush3.bf16.msra.mxu0 %v1199_v2  ;;  %p1327_p7 = por %p1326_p6, %p1325_p5 }
  0x52   :  { %1094 = vmatprep.subr.bf16.mxu0 %v1358_v0 }
  0x53   :  { %p1328_p8 = pnand %p1327_p7, %p1321_p4 }
  0x54   :  { %1085 = vmatmul.mubr.msk.bf16.vlgmr.msra.gmra.mrb[0].mxu0 %vm132_vm1, %v76_v5 }
  0x55   :  { %1096 = vmatprep.mubr.msk.bf16.mxu0 %vm1359_vm0, %v1358_v0 }
 0x127   :  { %v170_v7 = vpop.f32.mrb[0].mxu0 }
 0x128   :  { %v171_v8 = vadd.f32 %v1013_v6, %v170_v7  ;;  %v1086_v9 = vpop.f32.mrb[1].mxu0 }
 0x129   :  { %v173_v10 = vpop.f32.mrb[2].mxu0 }
 0x12a   :  { %v174_v11 = vadd.f32 %v1013_v6, %v173_v10  ;;  %v1087_v12 = vpop.f32.mrb[3].mxu0  ;;  %v177_v13 = vmul.f32 0.17677669, %v171_v8 }
 0x12c   :  { %v178_v14 = vmul.f32 0.17677669, %v174_v11  ;;  %v180_v15 = vpack.c.bf16 %v174_v11, %v171_v8 }
 0x12e   :  { %v179_v16 = vpack.c.bf16 %v178_v14, %v177_v13  ;;  %184 = vrot.lane.b32.xlu0 %v180_v15, %s1360_s3  ;;  %v1202_v13 = vld [vmem:[#allocation7 + $0x20] sm:$0xff]  }
 0x1a0   :  { %v185_v17 = vpop.permute.xlu0 %184 }
 0x1a1   :  { %v190_v18 = vsel %vm132_vm1, %v185_v17, 0 }
 0x1a2   :  { %1089 = vmatpush3.bf16.xpose.msra.mxu1 %v190_v18 }
 0x1a3   :  { %1100 = vmatprep.subr.bf16.mxu1 %v1358_v0 }
 0x1a9   :  { %1091 = vmatmul.mubr.msk.bf16.vlgmr.msra.gmra.mrb[0].mxu1 %vm132_vm1, %v179_v16 }
 0x1aa   :  { %1104 = vmatprep.mubr.msk.bf16.mxu1 %vm1359_vm0, %v1358_v0  ;;  %1101 = vmatpush3.bf16.msra.mxu1 %v1200_v39 }
 0x1ab   :  { %1102 = vmatprep.subr.bf16.mxu1 %v1358_v0 }
 0x1ae   :  { %1103 = vmatpush3.bf16.msra.mxu1 %v1201_v48 }
 0x1af   :  { %1116 = vmatprep.subr.bf16.mxu1 %v1358_v0 }
 0x27c   :  { %v226_v20 = vpop.f32.mrb[0].mxu1 }
 0x27d   :  { %v227_v22 = vadd.f32 %v226_v20, %v181_v19  ;;  %v1092_v23 = vpop.f32.mrb[1].mxu1 }
 0x27e   :  { %v229_v24 = vpop.f32.mrb[2].mxu1 }
 0x27f   :  { %v230_v25 = vadd.f32 %v229_v24, %v182_v21  ;;  %v1093_v26 = vpop.f32.mrb[3].mxu1  ;;  %v234_v27 = vsel %vm233_vm2, %v227_v22, -inf }
 0x280   :  { %235 = vmax.xlane.f32.xlu0 %v234_v27  ;;  %v1024_v26 = vld [vmem:[#allocation8 + $0x3] ss:$0 sm:$0xff] }
 0x281   :  { %v237_v28 = vsel %vm233_vm2, %v230_v25, -inf }
 0x282   :  { %238 = vmax.xlane.f32.xlu1 %v237_v28 }
 0x30d   :  { %v236_v29 = vpop.xlane.xlu0 %235 }
 0x30e   :  { %v240_v30 = vsub.f32 %v227_v22, %v236_v29  ;;  %v1023_v22 = vld [vmem:[#allocation8 + $0x2] ss:$0 sm:$0xff] }
 0x30f   :  { %v239_v31 = vpop.xlane.xlu1 %238 }
 0x310   :  { %v242_v32 = vmul.f32 1.442695, %v240_v30  ;;  %v241_v33 = vsub.f32 %v230_v25, %v239_v31  ;;  %v1204_v31 = vld [vmem:[#allocation7 + $0x30] sm:$0xff]  }
 0x312   :  { %1208 = vpow2.f32 %v242_v32  ;;  %v244_v34 = vmul.f32 1.442695, %v241_v33  ;;  %v1205_v32 = vld [vmem:[#allocation7 + $0x38] sm:$0xff]   ;;  %v1206_v33 = vld [vmem:[#allocation7 + $0x40] sm:$0xff]  }
 0x314   :  { %1210 = vpow2.f32 %v244_v34  ;;  %v1207_v34 = vld [vmem:[#allocation7 + $0x48] sm:$0xff]  }
 0x31c   :  { %v1209_v35 = vpop.eup %1208 }
 0x31d   :  { %v246_v36 = vsel %vm233_vm2, %v1209_v35, 0.0 }
 0x31e   :  { %v1211_v37 = vpop.eup %1210  ;;  %247 = vadd.xlane.f32.xlu1 %v246_v36 }
 0x31f   :  { %v249_v38 = vsel %vm233_vm2, %v1211_v37, 0.0 }
 0x322   :  { %250 = vadd.xlane.f32.xlu1 %v249_v38 }
 0x333   :  { %257 = vrot.lane.b32.xlu1 %v180_v15, %s1355_s0 }
 0x3ab   :  { %v248_v40 = vpop.xlane.xlu1 %247 }
 0x3ac   :  { %1212 = vrcp.f32 %v248_v40 }
 0x3af   :  { %v251_v41 = vpop.xlane.xlu1 %250 }
 0x3b0   :  { %1214 = vrcp.f32 %v251_v41 }
 0x3b3   :  { %v258_v42 = vpop.permute.xlu1 %257 }
 0x3b4   :  { %1095 = vmatpush3.bf16.msra.mxu0 %v258_v42 }
 0x3b5   :  { %1108 = vmatprep.subr.bf16.mxu0 %v1358_v0 }
 0x3b6   :  { %v1213_v43 = vpop.eup %1212 }
 0x3b7   :  { %v254_v45 = vmul.f32 %v1213_v43, %v1209_v35  ;;  %v1025_v35 = vld [vmem:[#allocation8 + $0x4] ss:$0 sm:$0xff] }
 0x3ba   :  { %v1215_v44 = vpop.eup %1214 }
 0x3bb   :  { %v255_v46 = vmul.f32 %v1215_v44, %v1211_v37 }
 0x3bd   :  { %v256_v47 = vpack.c.bf16 %v255_v46, %v254_v45 }
 0x3bf   :  { %1097 = vmatmul.mubr.msk.bf16.vlgmr.msra.gmra.mrb[4].mxu0 %vm233_vm2, %v256_v47 }
 0x3c0   :  { %1112 = vmatprep.mubr.msk.bf16.mxu0 %vm1359_vm0, %v1358_v0  ;;  %1109 = vmatpush3.bf16.msra.mxu0 %v1202_v13 }
 0x3c1   :  { %1110 = vmatprep.subr.bf16.mxu0 %v1358_v0 }
 0x492   :  { %v297_v49 = vpop.f32.mrb[4].mxu0 }
 0x493   :  { %v1098_v50 = vpop.f32.mrb[5].mxu0 }
 0x494   :  { %v300_v51 = vpop.f32.mrb[6].mxu0 }
 0x495   :  { %v304_v52 = vpack.c.bf16 %v300_v51, %v297_v49  ;;  %v1099_v53 = vpop.f32.mrb[7].mxu0 }
 0x497   :  { %1105 = vmatmul.mubr.msk.bf16.vlgmr.msra.gmra.mrb[4].mxu1 %vm132_vm1, %v304_v52 }
 0x498   :  { %1124 = vmatprep.mubr.msk.bf16.mxu1 %vm1359_vm0, %v1358_v0  ;;  %1117 = vmatpush3.bf16.msra.mxu1 %v1204_v31 }
 0x499   :  { %1118 = vmatprep.subr.bf16.mxu1 %v1358_v0 }
 0x49c   :  { %1119 = vmatpush3.bf16.msra.mxu1 %v1205_v32 }
 0x49d   :  { %1120 = vmatprep.subr.bf16.mxu1 %v1358_v0 }
 0x4a0   :  { %1121 = vmatpush3.bf16.msra.mxu1 %v1206_v33 }
 0x4a1   :  { %1122 = vmatprep.subr.bf16.mxu1 %v1358_v0 }
 0x4a4   :  { %1123 = vmatpush3.bf16.msra.mxu1 %v1207_v34 }
 0x56a   :  { %v358_v55 = vpop.f32.mrb[4].mxu1 }
 0x56b   :  { %v359_v56 = vadd.f32 %v1019_v54, %v358_v55  ;;  %v1106_v57 = vpop.f32.mrb[5].mxu1 }
 0x56c   :  { %v361_v58 = vpop.f32.mrb[6].mxu1 }
 0x56d   :  { %v362_v59 = vadd.f32 %v1019_v54, %v361_v58  ;;  %v1107_v60 = vpop.f32.mrb[7].mxu1  ;;  %v365_v61 = vadd.f32 %v359_v56, %v1460_v3 }
 0x56f   :  { %v367_v62 = vsel %vm132_vm1, %v365_v61, 0.0  ;;  %v366_v63 = vadd.f32 %v362_v59, %v1462_v4  ;;  %v1203_v4 = vld [vmem:[#allocation7 + $0x28] sm:$0xff]  }
 0x570   :  { %368 = vadd.xlane.f32.xlu1 %v367_v62  ;;  %1111 = vmatpush3.bf16.msra.mxu0 %v1203_v4 }
 0x571   :  { %v370_v1 = vsel %vm132_vm1, %v366_v63, 0.0 }
 0x572   :  { %371 = vadd.xlane.f32.xlu0 %v370_v1 }
 0x5fd   :  { %v369_v2 = vpop.xlane.xlu1 %368 }
 0x5fe   :  { %v374_v5 = vmul.f32 0.03125, %v369_v2 }
 0x5ff   :  { %v372_v6 = vpop.xlane.xlu0 %371 }
 0x600   :  { %v376_v7 = vsub.f32 %v365_v61, %v374_v5  ;;  %v375_v8 = vmul.f32 0.03125, %v372_v6  ;;  %v1029_v61 = vld [vmem:[#allocation8 + $0x5] ss:$0 sm:$0xff] }
 0x602   :  { %v377_v9 = vsub.f32 %v366_v63, %v375_v8  ;;  %v378_v10 = vmul.f32 %v376_v7, %v376_v7 }
 0x604   :  { %v380_v11 = vsel %vm132_vm1, %v378_v10, 0.0  ;;  %v379_v12 = vmul.f32 %v377_v9, %v377_v9 }
 0x605   :  { %381 = vadd.xlane.f32.xlu0 %v380_v11 }
 0x606   :  { %v383_v3 = vsel %vm132_vm1, %v379_v12, 0.0 }
 0x609   :  { %384 = vadd.xlane.f32.xlu0 %v383_v3 }
 0x692   :  { %v382_v14 = vpop.xlane.xlu0 %381 }
 0x693   :  { %v386_v15 = vmul.f32 0.03125, %v382_v14 }
 0x695   :  { %v388_v16 = vadd.f32 1e-12, %v386_v15 }
 0x696   :  { %v385_v17 = vpop.xlane.xlu0 %384 }
 0x697   :  { %1216 = vrsqrt.f32 %v388_v16  ;;  %v387_v18 = vmul.f32 0.03125, %v385_v17 }
 0x699   :  { %v389_v19 = vadd.f32 1e-12, %v387_v18 }
 0x69b   :  { %1218 = vrsqrt.f32 %v389_v19  ;;  %v1361_v19 = vmov 0.0|0.0  }
 0x69c   :  { %1167 = vmatprep.subr.bf16.mxu0 %v1361_v19  ;;  %1176 = vmatprep.subr.bf16.mxu1 %v1361_v19 }
 0x6a1   :  { %v1217_v20 = vpop.eup %1216 }
 0x6a2   :  { %v392_v21 = vmul.f32 %v1217_v20, %v376_v7 }
 0x6a4   :  { %v398_v24 = vmul.f32 %v1023_v22, %v392_v21 }
 0x6a5   :  { %v1219_v23 = vpop.eup %1218 }
 0x6a6   :  { %v393_v25 = vmul.f32 %v1219_v23, %v377_v9  ;;  %v404_v28 = vadd.f32 %v1024_v26, %v398_v24 }
 0x6a8   :  { %v399_v27 = vmul.f32 %v1023_v22, %v393_v25 }
 0x6aa   :  { %v405_v29 = vadd.f32 %v1024_v26, %v399_v27  ;;  %v599_v26 = vlaneseq }
 0x6ac   :  { %v406_v30 = vpack.c.bf16 %v405_v29, %v404_v28  ;;  %v600_v27 = vshrl.u32 %v599_v26, 7 }
 0x6ae   :  { %1113 = vmatmul.mubr.msk.bf16.vlgmr.msra.gmra.mrb[8].mxu0 %vm132_vm1, %v406_v30  ;;  %v1035_v30 = vld [vmem:[#allocation8 + $0x6] ss:$0 sm:$0xff]  ;;  %v603_v31 = vmul.u32 8, %v600_v27 }
 0x6af   :  { %1132 = vmatprep.mubr.msk.f32.mxu0 %vm1359_vm0, %v1358_v0 }
 0x781   :  { %v460_v36 = vpop.f32.mrb[8].mxu0 }
 0x782   :  { %v461_v37 = vadd.f32 %v1025_v35, %v460_v36  ;;  %v1114_v38 = vpop.f32.mrb[9].mxu0  ;;  %v602_v36 = vand.u32 127, %v599_v26 }
 0x783   :  { %v463_v39 = vpop.f32.mrb[10].mxu0 }
 0x784   :  { %v467_v40 = vmul.f32 %v461_v37, %v461_v37  ;;  %v464_v41 = vadd.f32 %v1025_v35, %v463_v39  ;;  %v1115_v42 = vpop.f32.mrb[11].mxu0  ;;  %v1036_v35 = vld [vmem:[#allocation8 + $0x7] ss:$0 sm:$0xff] }
 0x785   :  { %v106_v42 = vld [vmem:[#allocation8 + $0x10] sm:$0xff] }
 0x786   :  { %v469_v43 = vmul.f32 %v467_v40, %v461_v37  ;;  %v468_v44 = vmul.f32 %v464_v41, %v464_v41 }
 0x788   :  { %v471_v45 = vmul.f32 0.044715, %v469_v43  ;;  %v470_v46 = vmul.f32 %v468_v44, %v464_v41 }
 0x78a   :  { %v473_v47 = vadd.f32 %v471_v45, %v461_v37  ;;  %v472_v48 = vmul.f32 0.044715, %v470_v46  ;;  %v107_v46 = vld [vmem:[#allocation8 + $0x18] sm:$0xff] }
 0x78c   :  { %v475_v49 = vmul.f32 0.7978846, %v473_v47  ;;  %v474_v50 = vadd.f32 %v472_v48, %v464_v41  ;;  %v108_v47 = vld [vmem:[#allocation8 + $0x20] sm:$0xff] }
 0x78d   :  { %v1174_v48 = vpack.c.bf16 %v108_v47, %v107_v46 }
 0x78e   :  { %1220 = vtanh.f32 %v475_v49  ;;  %v476_v51 = vmul.f32 0.7978846, %v474_v50  ;;  %v109_v49 = vld [vmem:[#allocation8 + $0x28] sm:$0xff]  ;;  %v110_v50 = vld [vmem:[#allocation8 + $0x30] sm:$0xff] }
 0x790   :  { %1222 = vtanh.f32 %v476_v51  ;;  %v1177_v51 = vpack.c.bf16 %v110_v50, %v109_v49 }
 0x798   :  { %v1221_v52 = vpop.eup %1220 }
 0x799   :  { %v479_v53 = vadd.f32 1.0, %v1221_v52 }
 0x79a   :  { %v1223_v54 = vpop.eup %1222 }
 0x79b   :  { %v481_v55 = vmul.f32 0.5, %v479_v53  ;;  %v480_v56 = vadd.f32 1.0, %v1223_v54 }
 0x79d   :  { %v482_v57 = vmul.f32 0.5, %v480_v56  ;;  %v483_v58 = vmul.f32 %v481_v55, %v461_v37  ;;  %v604_v37 = vadd.s32 7, %v603_v31  ;;  %v1039_v56 = vld [vmem:[#allocation8 + $0x38] ss:$0 sm:$0xff] }
 0x79f   :  { %v484_v59 = vmul.f32 %v482_v57, %v464_v41  ;;  %vm605_vm4 = vcmp.eq.s32.totalorder %v602_v36, %v604_v37  ;;  %v105_v41 = vld [vmem:[#allocation8 + $0x8] sm:$0xff] }
 0x7a0   :  { %v1037_v44 = vsel %vm605_vm4, 1.0, %v1358_v0  ;;  %v1171_v45 = vpack.c.bf16 %v106_v42, %v105_v41 }
 0x7a1   :  { %v485_v60 = vpack.c.bf16 %v484_v59, %v483_v58  ;;  %v1041_v58 = vld [vmem:[#allocation8 + $0x39] ss:$0 sm:$0xff] }
 0x7a3   :  { %1125 = vmatmul.mubr.msk.bf16.vlgmr.msra.gmra.mrb[8].mxu1 %vm514_vm3, %v485_v60 }
 0x7a4   :  { %1150 = vmatprep.mubr.msk.f32.mxu1 %vm1359_vm0, %v1358_v0  ;;  %1178 = vmatpush3.bf16.msra.mxu1 %v1177_v51 }
 0x7a5   :  { %1182 = vmatprep.subr.bf16.mxu1 %v1361_v19 }
 0x7ab   :  { %1151 = vmatmul.mubr.f32.vlgmr.msra.gmra.mrb[12].mxu1 %v1358_v0 }
 0x7ac   :  { %1164 = vmatprep.mubr.msk.f32.mxu1 %vm1359_vm0, %v1358_v0 }
 0x876   :  { %v552_v62 = vpop.f32.mrb[8].mxu1 }
 0x877   :  { %v553_v63 = vadd.f32 %v1029_v61, %v552_v62  ;;  %v1126_v1 = vpop.f32.mrb[9].mxu1 }
 0x878   :  { %v555_v2 = vpop.f32.mrb[10].mxu1  ;;  %v113_v1 = vld [vmem:[#allocation8 + $0x40] sm:$0xff] }
 0x879   :  { %v556_v5 = vadd.f32 %v1029_v61, %v555_v2  ;;  %v1127_v6 = vpop.f32.mrb[11].mxu1  ;;  %v559_v7 = vadd.f32 %v553_v63, %v404_v28  ;;  %v114_v2 = vld [vmem:[#allocation8 + $0x48] sm:$0xff] }
 0x87b   :  { %v561_v8 = vsel %vm132_vm1, %v559_v7, 0.0  ;;  %v560_v9 = vadd.f32 %v556_v5, %v405_v29  ;;  %v1183_v5 = vpack.c.bf16 %v114_v2, %v113_v1 }
 0x87c   :  { %562 = vadd.xlane.f32.xlu0 %v561_v8 }
 0x87d   :  { %v564_v10 = vsel %vm132_vm1, %v560_v9, 0.0  ;;  %1184 = vmatpush3.bf16.msra.mxu1 %v1183_v5 }
 0x87e   :  { %v832_v54 = vpop.f32.mrb[12].mxu1 }
 0x87f   :  { %v1152_v55 = vpop.f32.mrb[13].mxu1 }
 0x880   :  { %565 = vadd.xlane.f32.xlu0 %v564_v10 }
 0x909   :  { %v563_v11 = vpop.xlane.xlu0 %562 }
 0x90a   :  { %v567_v12 = vmul.f32 0.03125, %v563_v11  ;;  %v1043_v11 = vld [vmem:[#allocation8 + $0x50] ss:$0 sm:$0xff] }
 0x90c   :  { %v569_v3 = vsub.f32 %v559_v7, %v567_v12 }
 0x90d   :  { %v566_v13 = vpop.xlane.xlu0 %565 }
 0x90e   :  { %v568_v4 = vmul.f32 0.03125, %v566_v13  ;;  %v571_v14 = vmul.f32 %v569_v3, %v569_v3 }
 0x910   :  { %v570_v15 = vsub.f32 %v560_v9, %v568_v4  ;;  %v573_v16 = vsel %vm132_vm1, %v571_v14, 0.0 }
 0x911   :  { %574 = vadd.xlane.f32.xlu0 %v573_v16 }
 0x912   :  { %v572_v17 = vmul.f32 %v570_v15, %v570_v15 }
 0x914   :  { %v576_v18 = vsel %vm132_vm1, %v572_v17, 0.0 }
 0x915   :  { %577 = vadd.xlane.f32.xlu0 %v576_v18 }
 0x99e   :  { %v575_v20 = vpop.xlane.xlu0 %574 }
 0x99f   :  { %v579_v21 = vmul.f32 0.03125, %v575_v20 }
 0x9a1   :  { %v581_v22 = vadd.f32 1e-12, %v579_v21 }
 0x9a2   :  { %v578_v23 = vpop.xlane.xlu0 %577 }
 0x9a3   :  { %1224 = vrsqrt.f32 %v581_v22  ;;  %v580_v24 = vmul.f32 0.03125, %v578_v23 }
 0x9a5   :  { %v582_v25 = vadd.f32 1e-12, %v580_v24 }
 0x9a7   :  { %1226 = vrsqrt.f32 %v582_v25 }
 0x9ad   :  { %v1225_v28 = vpop.eup %1224 }
 0x9ae   :  { %v585_v29 = vmul.f32 %v1225_v28, %v569_v3 }
 0x9b0   :  { %v591_v34 = vmul.f32 %v1035_v30, %v585_v29 }
 0x9b1   :  { %v1227_v32 = vpop.eup %1226 }
 0x9b2   :  { %v586_v33 = vmul.f32 %v1227_v32, %v570_v15  ;;  %v597_v39 = vadd.f32 %v1036_v35, %v591_v34 }
 0x9b4   :  { %v592_v38 = vmul.f32 %v1035_v30, %v586_v33 }
 0x9b6   :  { %v598_v40 = vadd.f32 %v1036_v35, %v592_v38 }
 0x9b8   :  { %v1168_v43 = vpack.c.bf16 %v598_v40, %v597_v39 }
 0x9ba   :  { %1169 = vmatpush3.bf16.msra.mxu0 %v1168_v43 }
 0x9bb   :  { %1170 = vmatprep.subr.bf16.mxu0 %v1361_v19 }
 0x9bd   :  { %1133 = vmatmul.mubr.msk.f32.vlgmr.msra.gmra.mrb[12].mxu0 %vm233_vm2, %v1037_v44 }
 0x9be   :  { %1172 = vmatpush3.bf16.msra.mxu0 %v1171_v45  ;;  %1143 = vmatprep.mubr.msk.f32.mxu0 %vm1359_vm0, %v1358_v0 }
 0x9bf   :  { %1173 = vmatprep.subr.bf16.mxu0 %v1361_v19 }
 0x9c2   :  { %1175 = vmatpush3.bf16.msra.mxu0 %v1174_v48 }
 0x9c3   :  { %1179 = vmatprep.subr.bf16.mxu0 %v1361_v19 }
 0xa90   :  { %v677_v52 = vpop.f32.mrb[12].mxu0 }
 0xa91   :  { %1144 = vmatmul.mubr.msk.f32.vlgmr.msra.gmra.mrb[14].mxu0 %vm132_vm1, %v677_v52  ;;  %v1134_v53 = vpop.f32.mrb[13].mxu0 }
 0xa92   :  { %1181 = vmatpush3.bf16.msra.mxu0 %v1177_v51  ;;  %1157 = vmatprep.mubr.msk.f32.mxu0 %vm1359_vm0, %v1358_v0 }
 0xb64   :  { %v754_v57 = vpop.f32.mrb[14].mxu0 }
 0xb65   :  { %v755_v59 = vadd.f32 %v1039_v56, %v754_v57  ;;  %v1145_v60 = vpop.f32.mrb[15].mxu0 }
 0xb67   :  { %v762_v61 = vadd.f32 %v1041_v58, %v755_v59 }
 0xb69   :  { %v836_v62 = vadd.f32 %v832_v54, %v762_v61 }
 0xb6b   :  { %1228 = vtanh.f32 %v836_v62 }
 0xb75   :  { %v1229_v63 = vpop.eup %1228 }
 0xb76   :  { %1158 = vmatmul.mubr.msk.f32.vlgmr.msra.gmra.mrb[16].mxu0 %vm233_vm2, %v1229_v63 }
 0xc49   :  { %v907_v6 = vpop.f32.mrb[16].mxu0 }
 0xc4a   :  { %v912_v7 = vrot.slane %v907_v6, 7  ;;  %v1159_v0 = vpop.f32.mrb[17].mxu0 }
 0xc4c   :  { %v914_v8 = vadd.f32 %v912_v7, %v762_v61 }
 0xc4e   :  { %1230 = vtanh.f32 %v914_v8 }
 0xc58   :  { %v1231_v9 = vpop.eup %1230 }
 0xc59   :  { %v917_v10 = vsel %vm916_vm5, %v1229_v63, %v1231_v9 }
 0xc5a   :  { %1165 = vmatmul.mubr.msk.f32.vlgmr.msra.gmra.mrb[14].mxu1 %vm233_vm2, %v917_v10 }
 0xd2d   :  { %v991_v12 = vpop.f32.mrb[14].mxu1 }
 0xd2e   :  { %v992_v3 = vadd.f32 %v1043_v11, %v991_v12  ;;  %v1166_v13 = vpop.f32.mrb[15].mxu1 }
 0xd30   :  { %995 = vst [vmem:[#allocation10] sm:$0x3] %v992_v3 }
 0xd31   :  { %1331 = shalt.err (!%p1328_p8)
}
 0xd32   :  { %s1332_s16 = scalar_lea.hbm %s1537_s4, 32 }
 0xd33   :  { %p1333_p9 = scmp.ne.s32.totalorder %s1537_s4, %s1332_s16  ;;  %p1336_p10 = scmp.lt.u32.totalorder %s1332_s16, %s1537_s4 }
 0xd35   :  { %p1338_p11 = pnand %p1336_p10, %p1333_p9 }
 0xd37   :  { %1341 = shalt.err (!%p1338_p11)
}
 0xd38   :  { %1005 = dma.vmem_to_hbm [thread:$0]  %s1003_s28, 32, %s1537_s4, [#allocation4]  }
 0xd39   :  { %1348 = dma.done.wait [#allocation4], 32  }
 0xd3a   :  { %1349 = vsyncadd [#allocation4], 4294967264 }
 0xd3b   :  { %1009 = vsyncpa [#allocation3], 1 }
 0xd3c   :  { %1010 = vsyncpa [#allocation6], 1 }
 0xd3d   :  { %1011 = vsyncpa [#allocation9], 1 }
 0xd3e   :  { %1012 = vsyncpa [#allocation4], 1 }

</bundles_post_ra>
